<compile_context>
chip_gen: v7x
topology: tpu7x:2x2x1
jax: 0.10.0
libtpu: 0.0.40
codegen_flags: <defaults>
</compile_context>

<pallas_src>
import functools
import math

import jax
import jax.numpy as jnp
from jax.experimental import pallas as pl
from jax.experimental.pallas import tpu as pltpu


def _seesaw_kernel(cls_ref, labels_ref, lw_ref, logcum_ref, logcum_self_ref, out_ref,
                   *, p, q, log_eps, n_real, tile_n, fuse_second_lse):
    x = cls_ref[...].astype(jnp.float32)            # (TN, C) widen right after VMEM load
    labels = labels_ref[...]                        # (TN, 1) int32
    lw = lw_ref[...].astype(jnp.float32)            # (TN, 1)
    log_cum = logcum_ref[...]                       # (1, C)  = log(clamp(cum_samples, 1))
    log_cum_self = logcum_self_ref[...]             # (TN, 1) = log_cum gathered at label

    tn, c = x.shape
    col = jax.lax.broadcasted_iota(jnp.int32, (tn, c), 1)
    mask = col == labels                            # bool one-hot (no f32 one-hot)

    # --- single stabilized log-softmax over the class axis ---
    m = jnp.max(x, axis=1, keepdims=True)
    e1 = jnp.exp(x - m)
    lse = jnp.log(jnp.sum(e1, axis=1, keepdims=True)) + m

    # label-column logit: the only masked gather needed.  log_seesaw is identically 0
    # in the label column, so the CE target is x_self and logp[label] = x_self - lse.
    x_self = jnp.sum(jnp.where(mask, x, 0.0), axis=1, keepdims=True)

    # --- seesaw factor in log space ---
    log_seesaw = jnp.zeros_like(x)
    if p > 0:
        # mitigation: ratio = cum[c]/cum[label]; factor = ratio^p if ratio < 1 else 1
        log_ratio = log_cum - log_cum_self          # (1,C)-(TN,1) -> (TN,C)
        log_seesaw = log_seesaw + jnp.where(log_ratio < 0.0, p * log_ratio, 0.0)
    if q > 0:
        # compensation: sm = softmax(x)[c]/max(softmax(x)[label], eps); sm^q if sm > 1
        logp_self = x_self - lse
        log_sm = (x - lse) - jnp.maximum(logp_self, log_eps)
        log_seesaw = log_seesaw + jnp.where(log_sm > 0.0, q * log_sm, 0.0)

    # --- second logsumexp over the seesaw-modified logits ---
    if fuse_second_lse:
        # reuse e1 = exp(x - m); safe because log_seesaw <= q*(-log eps) (small).
        lse2 = jnp.log(jnp.sum(e1 * jnp.exp(log_seesaw), axis=1, keepdims=True)) + m
    else:
        mod = x + log_seesaw                        # label column unchanged (log_seesaw==0)
        mm = jnp.max(mod, axis=1, keepdims=True)
        lse2 = jnp.log(jnp.sum(jnp.exp(mod - mm), axis=1, keepdims=True)) + mm

    per_row = (lse2 - x_self) * lw                  # (TN, 1) weighted cross-entropy

    # ragged last tile: rows past N hold unspecified data -> gate them out explicitly
    row = pl.program_id(0) * tile_n + jax.lax.broadcasted_iota(jnp.int32, (tn, 1), 0)
    per_row = jnp.where(row < n_real, per_row, 0.0)

    partial = jnp.sum(per_row, keepdims=True)       # (1, 1)
    out_ref[...] = jnp.broadcast_to(partial[None, :, :], (1, 1, 128))


def _choose_tile_n(n, c, dtype_bytes):
    """Row-tile size from a VMEM byte budget (double-buffered logits block)."""
    # sublane packing multiple: 8 for 32-bit, 16 for 16-bit, 32 for 8-bit dtypes
    sub = 8 * max(1, 4 // max(1, dtype_bytes))
    budget = 4 * 1024 * 1024                        # bytes per logits buffer (x2 buffers)
    tile = budget // max(1, c * dtype_bytes)
    tile = min(tile, 2048)                          # step overhead fully amortized here
    # keep >= ~4 grid steps when N allows (v7x 2-TC split + pipeline depth)
    if n >= 4 * sub:
        tile = min(tile, pl.cdiv(n, 4))
    tile = max(sub, (tile // sub) * sub)            # multiple of sublane packing
    tile = min(tile, pl.cdiv(n, sub) * sub)         # never larger than rounded batch
    return tile


def seesaw_ce_loss_pallas(cls_score, labels, label_weights, cum_samples,
                          *, p, q, eps, loss_weight):
    n, c = cls_score.shape
    dtype_bytes = jnp.dtype(cls_score.dtype).itemsize

    tile_n = _choose_tile_n(n, c, dtype_bytes)
    num_tiles = pl.cdiv(n, tile_n)

    labels_i = labels.astype(jnp.int32).reshape(n, 1)
    lw = label_weights.astype(jnp.float32).reshape(n, 1)

    # log(clamp(cum_samples, 1)) computed once on the tiny (C,) vector; label-column
    # gather hoisted to the wrapper as a (N, 1) input.
    log_cum = jnp.log(jnp.maximum(cum_samples.astype(jnp.float32), 1.0))
    log_cum_self = log_cum[labels.astype(jnp.int32)].reshape(n, 1)
    log_cum_row = log_cum.reshape(1, c)

    log_eps = float(math.log(eps))
    fuse_second_lse = (q * (-log_eps)) <= 40.0      # exp stays far from f32 overflow

    kernel = functools.partial(
        _seesaw_kernel, p=p, q=q, log_eps=log_eps,
        n_real=n, tile_n=tile_n, fuse_second_lse=fuse_second_lse)

    partials = pl.pallas_call(
        kernel,
        out_shape=jax.ShapeDtypeStruct((num_tiles, 1, 128), jnp.float32),
        grid=(num_tiles,),
        in_specs=[
            pl.BlockSpec((tile_n, c), lambda i: (i, 0)),   # logits row tile (native dtype)
            pl.BlockSpec((tile_n, 1), lambda i: (i, 0)),   # labels row tile
            pl.BlockSpec((tile_n, 1), lambda i: (i, 0)),   # label_weights row tile
            pl.BlockSpec((1, c), lambda i: (0, 0)),        # log cum_samples (shared)
            pl.BlockSpec((tile_n, 1), lambda i: (i, 0)),   # log cum_samples at the label
        ],
        out_specs=pl.BlockSpec((1, 1, 128), lambda i: (i, 0, 0)),
        compiler_params=pltpu.CompilerParams(
            dimension_semantics=("parallel",),             # row tiles are independent
            vmem_limit_bytes=32 * 1024 * 1024),            # explicit (v5e default is 16 MiB)
    )(cls_score, labels_i, lw, log_cum_row, log_cum_self)

    # reduction='mean', avg_factor=None, scaled by loss_weight
    # TODO(synk): reduction='none'/'sum' and avg_factor paths are not emitted from the kernel.
    return (loss_weight / n) * jnp.sum(partials[:, 0, 0])


class SeesawLossPallas:
    """Stateless-kernel / stateful-buffer re-implementation of SeesawLoss.forward."""

    def __init__(self, p=0.8, q=2.0, num_classes=16, eps=0.01,
                 reduction='mean', loss_weight=1.0):
        assert reduction == 'mean'
        self.p, self.q = p, q
        self.num_classes = num_classes
        self.eps = eps
        self.loss_weight = loss_weight
        # register_buffer('cum_samples', zeros(num_classes)) -> deterministic init
        self.cum_samples = jnp.zeros((num_classes,), jnp.float32)

    def __call__(self, cls_score, labels, label_weights=None):
        n = labels.shape[0]
        # buffer update: cum_samples[u] += count(labels == u)  (histogram add, stays in JAX)
        hist = jnp.zeros((self.num_classes,), jnp.float32).at[labels].add(1.0)
        self.cum_samples = self.cum_samples + hist
        if label_weights is None:
            label_weights = jnp.ones((n,), jnp.float32)
        return seesaw_ce_loss_pallas(
            cls_score, labels, label_weights, self.cum_samples,
            p=self.p, q=self.q, eps=self.eps, loss_weight=self.loss_weight)


def _reference_loss(cls_score, labels, label_weights, cum_samples,
                    p, q, eps, loss_weight):
    """Pure-JAX reference mirroring seesaw_ce_loss (mean reduction)."""
    n, c = cls_score.shape
    cls_score = cls_score.astype(jnp.float32)
    onehot = jax.nn.one_hot(labels, c, dtype=jnp.float32)
    seesaw = jnp.ones((n, c), jnp.float32)
    cum_c = jnp.maximum(cum_samples, 1.0)
    ratio = cum_c[None, :] / cum_c[:, None]
    mit_all = jnp.where(ratio < 1.0, ratio ** p, 1.0)
    seesaw = seesaw * mit_all[labels, :]
    scores = jax.nn.softmax(cls_score, axis=1)
    self_scores = scores[jnp.arange(n), labels]
    score_matrix = scores / jnp.maximum(self_scores, eps)[:, None]
    comp = jnp.where(score_matrix > 1.0, score_matrix ** q, 1.0)
    seesaw = seesaw * comp
    mod = cls_score + jnp.log(seesaw) * (1.0 - onehot)
    logp = jax.nn.log_softmax(mod, axis=1)
    loss = -logp[jnp.arange(n), labels] * label_weights
    return loss_weight * jnp.mean(loss)


if __name__ == "__main__":
    key = jax.random.PRNGKey(0)
    C = 16
    module = SeesawLossPallas(p=0.8, q=2.0, num_classes=C, eps=0.01,
                              reduction='mean', loss_weight=1.0)

    # ---- test 1: small aligned batch (N=8, C=16) ----
    k1, k2, k3, key = *jax.random.split(key, 3), jax.random.split(key, 4)[3]
    N = 8
    cls_score = jax.random.normal(k1, (N, C), dtype=jnp.float32)
    labels = jax.random.randint(k2, (N,), 0, C, dtype=jnp.int32)
    label_weights = jax.random.uniform(k3, (N,), dtype=jnp.float32) + 0.5

    loss = jax.block_until_ready(module(cls_score, labels, label_weights))
    ref = _reference_loss(cls_score, labels, label_weights, module.cum_samples,
                          p=0.8, q=2.0, eps=0.01, loss_weight=1.0)
    assert jnp.allclose(loss, ref, rtol=1e-5, atol=1e-5), (loss, ref)

    # ---- test 2: ragged batch (N=37) exercises the in-kernel row-validity gate ----
    k1, k2, k3 = jax.random.split(key, 3)
    N2 = 37
    cls_score2 = jax.random.normal(k1, (N2, C), dtype=jnp.float32)
    labels2 = jax.random.randint(k2, (N2,), 0, C, dtype=jnp.int32)
    label_weights2 = jax.random.uniform(k3, (N2,), dtype=jnp.float32) + 0.5

    loss2 = jax.block_until_ready(module(cls_score2, labels2, label_weights2))
    ref2 = _reference_loss(cls_score2, labels2, label_weights2, module.cum_samples,
                           p=0.8, q=2.0, eps=0.01, loss_weight=1.0)
    assert jnp.allclose(loss2, ref2, rtol=1e-5, atol=1e-5), (loss2, ref2)

    print("KERNEL_OK")
</pallas_src>

<mosaic_0001>
module attributes {stable_mosaic.version = 11 : i64} {
  func.func @_seesaw_kernel(%arg0: i32, %arg1: memref<8x16xf32, #tpu.memory_space<vmem>>, %arg2: memref<8x1xi32, #tpu.memory_space<vmem>>, %arg3: memref<8x1xf32, #tpu.memory_space<vmem>>, %arg4: memref<1x16xf32, #tpu.memory_space<vmem>>, %arg5: memref<8x1xf32, #tpu.memory_space<vmem>>, %arg6: memref<1x1x128xf32, #tpu.memory_space<vmem>>) attributes {dimension_semantics = [#tpu.dimension_semantics<parallel>], iteration_bounds = array<i64: 1>, scalar_prefetch = 0 : i64, scratch_operands = 0 : i64, tpu.core_type = #tpu.core_type<tc>, window_params = [{transform_indices = @transform_0, window_bounds = array<i64: 8, 16>}, {transform_indices = @transform_1, window_bounds = array<i64: 8, 1>}, {transform_indices = @transform_2, window_bounds = array<i64: 8, 1>}, {pipeline_mode = #tpu.pipeline_mode<synchronous>, transform_indices = @transform_3, window_bounds = array<i64: 1, 16>}, {transform_indices = @transform_4, window_bounds = array<i64: 8, 1>}, {transform_indices = @transform_5, window_bounds = array<i64: 1, 1, 128>}]} {
    %c0 = arith.constant 0 : index
    %c0_0 = arith.constant 0 : index
    %0 = vector.load %arg1[%c0, %c0_0] : memref<8x16xf32, #tpu.memory_space<vmem>>, vector<8x16xf32>
    %c0_1 = arith.constant 0 : index
    %c0_2 = arith.constant 0 : index
    %1 = vector.load %arg2[%c0_1, %c0_2] : memref<8x1xi32, #tpu.memory_space<vmem>>, vector<8x1xi32>
    %c0_3 = arith.constant 0 : index
    %c0_4 = arith.constant 0 : index
    %2 = vector.load %arg3[%c0_3, %c0_4] : memref<8x1xf32, #tpu.memory_space<vmem>>, vector<8x1xf32>
    %c0_5 = arith.constant 0 : index
    %c0_6 = arith.constant 0 : index
    %3 = vector.load %arg4[%c0_5, %c0_6] : memref<1x16xf32, #tpu.memory_space<vmem>>, vector<1x16xf32>
    %c0_7 = arith.constant 0 : index
    %c0_8 = arith.constant 0 : index
    %4 = vector.load %arg5[%c0_7, %c0_8] : memref<8x1xf32, #tpu.memory_space<vmem>>, vector<8x1xf32>
    %5 = tpu.iota {dimensions = array<i32: 1>} : vector<8x16xi32>
    %6 = vector.broadcast %1 : vector<8x1xi32> to vector<8x16xi32>
    %7 = arith.cmpi eq, %5, %6 : vector<8x16xi32>
    %cst = arith.constant dense<0xFF800000> : vector<8xf32>
    %8 = vector.multi_reduction <maximumf>, %0, %cst [1] : vector<8x16xf32> to vector<8xf32>
    %9 = vector.shape_cast %8 : vector<8xf32> to vector<8x1xf32>
    %10 = vector.broadcast %9 : vector<8x1xf32> to vector<8x16xf32>
    %11 = arith.subf %0, %10 : vector<8x16xf32>
    %12 = math.exp %11 : vector<8x16xf32>
    %cst_9 = arith.constant dense<0.000000e+00> : vector<8xf32>
    %13 = vector.multi_reduction <add>, %12, %cst_9 [1] : vector<8x16xf32> to vector<8xf32>
    %14 = vector.shape_cast %13 : vector<8xf32> to vector<8x1xf32>
    %15 = math.log %14 : vector<8x1xf32>
    %16 = arith.addf %15, %9 : vector<8x1xf32>
    %cst_10 = arith.constant 0.000000e+00 : f32
    %17 = vector.broadcast %cst_10 : f32 to vector<8x16xf32>
    %18 = arith.select %7, %0, %17 : vector<8x16xi1>, vector<8x16xf32>
    %cst_11 = arith.constant dense<0.000000e+00> : vector<8xf32>
    %19 = vector.multi_reduction <add>, %18, %cst_11 [1] : vector<8x16xf32> to vector<8xf32>
    %20 = vector.shape_cast %19 : vector<8xf32> to vector<8x1xf32>
    %cst_12 = arith.constant 0.000000e+00 : f32
    %21 = vector.broadcast %cst_12 : f32 to vector<8x16xf32>
    %22 = vector.broadcast %3 : vector<1x16xf32> to vector<8x16xf32>
    %23 = vector.broadcast %4 : vector<8x1xf32> to vector<8x16xf32>
    %24 = arith.subf %22, %23 : vector<8x16xf32>
    %cst_13 = arith.constant 0.000000e+00 : f32
    %25 = vector.broadcast %cst_13 : f32 to vector<8x16xf32>
    %26 = arith.cmpf olt, %24, %25 : vector<8x16xf32>
    %cst_14 = arith.constant 8.000000e-01 : f32
    %27 = vector.broadcast %cst_14 : f32 to vector<8x16xf32>
    %28 = arith.mulf %27, %24 : vector<8x16xf32>
    %cst_15 = arith.constant 0.000000e+00 : f32
    %29 = vector.broadcast %cst_15 : f32 to vector<8x16xf32>
    %30 = arith.select %26, %28, %29 : vector<8x16xi1>, vector<8x16xf32>
    %31 = arith.addf %21, %30 : vector<8x16xf32>
    %32 = arith.subf %20, %16 : vector<8x1xf32>
    %33 = vector.broadcast %16 : vector<8x1xf32> to vector<8x16xf32>
    %34 = arith.subf %0, %33 : vector<8x16xf32>
    %cst_16 = arith.constant -4.60517025 : f32
    %35 = vector.broadcast %cst_16 : f32 to vector<8x1xf32>
    %36 = arith.maximumf %32, %35 : vector<8x1xf32>
    %37 = vector.broadcast %36 : vector<8x1xf32> to vector<8x16xf32>
    %38 = arith.subf %34, %37 : vector<8x16xf32>
    %cst_17 = arith.constant 0.000000e+00 : f32
    %39 = vector.broadcast %cst_17 : f32 to vector<8x16xf32>
    %40 = arith.cmpf ogt, %38, %39 : vector<8x16xf32>
    %cst_18 = arith.constant 2.000000e+00 : f32
    %41 = vector.broadcast %cst_18 : f32 to vector<8x16xf32>
    %42 = arith.mulf %41, %38 : vector<8x16xf32>
    %cst_19 = arith.constant 0.000000e+00 : f32
    %43 = vector.broadcast %cst_19 : f32 to vector<8x16xf32>
    %44 = arith.select %40, %42, %43 : vector<8x16xi1>, vector<8x16xf32>
    %45 = arith.addf %31, %44 : vector<8x16xf32>
    %46 = math.exp %45 : vector<8x16xf32>
    %47 = arith.mulf %12, %46 : vector<8x16xf32>
    %cst_20 = arith.constant dense<0.000000e+00> : vector<8xf32>
    %48 = vector.multi_reduction <add>, %47, %cst_20 [1] : vector<8x16xf32> to vector<8xf32>
    %49 = vector.shape_cast %48 : vector<8xf32> to vector<8x1xf32>
    %50 = math.log %49 : vector<8x1xf32>
    %51 = arith.addf %50, %9 : vector<8x1xf32>
    %52 = arith.subf %51, %20 : vector<8x1xf32>
    %53 = arith.mulf %52, %2 : vector<8x1xf32>
    %c8_i32 = arith.constant 8 : i32
    %54 = arith.muli %arg0, %c8_i32 : i32
    %55 = tpu.iota {dimensions = array<i32: 0>} : vector<8x1xi32>
    %56 = vector.broadcast %54 : i32 to vector<8x1xi32>
    %57 = arith.addi %56, %55 : vector<8x1xi32>
    %c8_i32_21 = arith.constant 8 : i32
    %58 = vector.broadcast %c8_i32_21 : i32 to vector<8x1xi32>
    %59 = arith.cmpi slt, %57, %58 : vector<8x1xi32>
    %cst_22 = arith.constant 0.000000e+00 : f32
    %60 = vector.broadcast %cst_22 : f32 to vector<8x1xf32>
    %61 = arith.select %59, %53, %60 : vector<8x1xi1>, vector<8x1xf32>
    %62 = vector.shape_cast %61 : vector<8x1xf32> to vector<1x8x1xf32>
    %cst_23 = arith.constant dense<0.000000e+00> : vector<1xf32>
    %63 = vector.multi_reduction <add>, %62, %cst_23 [1, 2] : vector<1x8x1xf32> to vector<1xf32>
    %64 = vector.shape_cast %63 : vector<1xf32> to vector<1x1x1xf32>
    %65 = vector.extract %64[0, 0, 0] : f32 from vector<1x1x1xf32>
    %66 = vector.broadcast %65 : f32 to vector<1x1xf32>
    %67 = vector.shape_cast %66 : vector<1x1xf32> to vector<1x1x1xf32>
    %68 = vector.shape_cast %67 : vector<1x1x1xf32> to vector<1x1x1xf32>
    %69 = vector.broadcast %68 : vector<1x1x1xf32> to vector<1x1x128xf32>
    %c0_24 = arith.constant 0 : index
    %c0_25 = arith.constant 0 : index
    %c0_26 = arith.constant 0 : index
    %70 = vector.load %arg6[%c0_24, %c0_25, %c0_26] : memref<1x1x128xf32, #tpu.memory_space<vmem>>, vector<1x1x128xf32>
    tpu.vector_store %arg6[%c0_24, %c0_25, %c0_26], %69 {strides = array<i32>} : memref<1x1x128xf32, #tpu.memory_space<vmem>>, vector<1x1x128xf32>,
    return
  }
  func.func @transform_0(%arg0: i32) -> (i32, i32) {
    %c0_i32 = arith.constant 0 : i32
    %c0_i32_0 = arith.constant 0 : i32
    return %arg0, %c0_i32 : i32, i32
  }
  func.func @transform_1(%arg0: i32) -> (i32, i32) {
    %c0_i32 = arith.constant 0 : i32
    %c0_i32_0 = arith.constant 0 : i32
    return %arg0, %c0_i32 : i32, i32
  }
  func.func @transform_2(%arg0: i32) -> (i32, i32) {
    %c0_i32 = arith.constant 0 : i32
    %c0_i32_0 = arith.constant 0 : i32
    return %arg0, %c0_i32 : i32, i32
  }
  func.func @transform_3(%arg0: i32) -> (i32, i32) {
    %c0_i32 = arith.constant 0 : i32
    %c0_i32_0 = arith.constant 0 : i32
    %c0_i32_1 = arith.constant 0 : i32
    return %c0_i32, %c0_i32_0 : i32, i32
  }
  func.func @transform_4(%arg0: i32) -> (i32, i32) {
    %c0_i32 = arith.constant 0 : i32
    %c0_i32_0 = arith.constant 0 : i32
    return %arg0, %c0_i32 : i32, i32
  }
  func.func @transform_5(%arg0: i32) -> (i32, i32, i32) {
    %c0_i32 = arith.constant 0 : i32
    %c0_i32_0 = arith.constant 0 : i32
    %c0_i32_1 = arith.constant 0 : i32
    return %arg0, %c0_i32, %c0_i32_0 : i32, i32, i32
  }
}

</mosaic_0001>

<bundles_post_ra>
// kernel: tpu_custom_call.1
= control target key start
LH: loop header
LB: loop body
LE: loop exit
PB: predicated region body
PF: predicated region fallthrough
CT: control target
= control target key end

     0   :  { %vm32_vm0 = vcmask 130048   ;;  %s220_s0 = inlined_call_operand.vmem [shape: f32[8,16], index: 0, kind: input, shape index: {}]   ;;  %s221_s1 = inlined_call_operand.vmem [shape: s32[8,1], index: 1, kind: input, shape index: {}]   ;;  %s222_s2 = inlined_call_operand.vmem [shape: f32[8,1], index: 2, kind: input, shape index: {}]   ;;  %s223_s3 = inlined_call_operand.vmem [shape: f32[1,16], index: 3, kind: input, shape index: {}]   ;;  %s224_s4 = inlined_call_operand.vmem [shape: f32[8,1], index: 4, kind: input, shape index: {}]   ;;  %s225_s5 = inlined_call_operand.hbm [shape: f32[1,1,128], index: 5, kind: output, shape index: {}]  }
   0x1   :  { %v21_v0 = vld [vmem:[%s220_s0] sm:$0xff] }
   0x2   :  { %10 = vsyncpa [#allocation3], 0  ;;  %v33_v1 = vsel %vm32_vm0, %v21_v0, -inf  ;;  %v157_v2 = vmov 0   ;;  %v22_v3 = vld [vmem:[%s221_s1] sm:$0xff]  ;;  %v26_v6 = vlaneseq  ;;  %vm91_vm4 = vcmask 7168  }
   0x3   :  { %123 = vset.pattern.permute.xlu0 %v157_v2  ;;  %124 = vset.pattern.permute.xlu1 %v157_v2  ;;  %v25_v14 = vld [vmem:[%s224_s4] sm:$0xff]  ;;  %s158_s24 = smov [#allocation2]  }
   0x4   :  { %34 = vmax.xlane.f32.xlu0 %v33_v1  ;;  %v27_v8 = vand.u32 127, %v26_v6  ;;  %v118_v18 = vld [vmem:[%s223_s3] ss:$0 sm:$0xff]  ;;  %s110_s25 = sshll.u32 %s158_s24, 4  ;;  %s111_s25 = int_to_ptr.vmem [resolvable:$true] %s110_s25 }
   0x5   :  { %v23_v40 = vld [vmem:[%s222_s2] sm:$0xff]  ;;  %s133_s2 = scalar_lea.vmem %s111_s25, 16  ;;  %s137_s27 = scalar_lea.vmem %s111_s25, 32 }
   0x6   :  { %p134_p0 = scmp.ne.s32.totalorder %s111_s25, %s133_s2  ;;  %p138_p1 = scmp.lt.s32.totalorder %s111_s25, %s111_s25 }
   0x7   :  { %p139_p2 = scmp.lt.s32.totalorder %s137_s27, %s133_s2 }
   0x9   :  { %p140_p3 = por %p139_p2, %p138_p1 }
   0xb   :  { %p141_p4 = pnand %p140_p3, %p134_p0 }
  0x1a   :  { %29 = vperm.xlu0 %123, %v22_v3  }
  0x91   :  { %v35_v4 = vpop.xlane.xlu0 %34 }
  0x92   :  { %v36_v5 = vsub.f32 %v21_v0, %v35_v4 }
  0x94   :  { %v37_v7 = vmul.f32 1.442695, %v36_v5 }
  0x96   :  { %125 = vpow2.f32 %v37_v7 }
  0x99   :  { %v30_v9 = vpop.permute.xlu0 %29 }
  0x9a   :  { %vm31_vm1 = vcmp.eq.s32.totalorder %v27_v8, %v30_v9 }
  0x9b   :  { %v45_v10 = vsel %vm31_vm1, %v21_v0, 0.0 }
  0x9c   :  { %v46_v11 = vsel %vm32_vm0, %v45_v10, 0.0 }
  0x9d   :  { %47 = vadd.xlane.f32.xlu1 %v46_v11 }
  0xa0   :  { %v126_v12 = vpop.eup %125 }
  0xa1   :  { %v39_v13 = vsel %vm32_vm0, %v126_v12, 0.0 }
  0xa2   :  { %40 = vadd.xlane.f32.xlu1 %v39_v13 }
  0xb3   :  { %57 = vperm.xlu1 %124, %v25_v14  }
 0x12a   :  { %v48_v15 = vpop.xlane.xlu1 %47 }
 0x12f   :  { %v41_v16 = vpop.xlane.xlu1 %40 }
 0x130   :  { %127 = vlog2.f32 %v41_v16 }
 0x133   :  { %v58_v19 = vpop.permute.xlu1 %57 }
 0x134   :  { %v60_v22 = vsub.f32 %v118_v18, %v58_v19 }
 0x136   :  { %v62_v26 = vmul.f32 0.8, %v60_v22  ;;  %vm61_vm2 = vcmp.lt.f32.partialorder %v60_v22, 0.0 }
 0x138   :  { %v63_v29 = vsel %vm61_vm2, %v62_v26, 0.0 }
 0x13a   :  { %v128_v17 = vpop.eup %127 }
 0x13b   :  { %v43_v20 = vmul.f32 0.6931472, %v128_v17 }
 0x13d   :  { %v44_v21 = vadd.f32 %v43_v20, %v35_v4 }
 0x13f   :  { %v65_v23 = vsub.f32 %v48_v15, %v44_v21  ;;  %v66_v24 = vsub.f32 %v21_v0, %v44_v21 }
 0x141   :  { %v67_v25 = vmax.f32 %v65_v23, -4.6051702 }
 0x143   :  { %v68_v27 = vsub.f32 %v66_v24, %v67_v25 }
 0x145   :  { %vm69_vm3 = vcmp.gt.f32.partialorder %v68_v27, 0.0  ;;  %v70_v28 = vmul.f32 2.0, %v68_v27 }
 0x147   :  { %v71_v30 = vsel %vm69_vm3, %v70_v28, 0.0 }
 0x148   :  { %v72_v31 = vadd.f32 %v71_v30, %v63_v29 }
 0x14a   :  { %v73_v32 = vmul.f32 1.442695, %v72_v31 }
 0x14c   :  { %129 = vpow2.f32 %v73_v32 }
 0x156   :  { %v130_v33 = vpop.eup %129 }
 0x157   :  { %v75_v34 = vmul.f32 %v130_v33, %v126_v12 }
 0x159   :  { %v76_v35 = vsel %vm32_vm0, %v75_v34, 0.0 }
 0x15a   :  { %77 = vadd.xlane.f32.xlu1 %v76_v35 }
 0x1e7   :  { %v78_v36 = vpop.xlane.xlu1 %77 }
 0x1e8   :  { %131 = vlog2.f32 %v78_v36 }
 0x1f2   :  { %v132_v37 = vpop.eup %131 }
 0x1f3   :  { %v80_v38 = vmul.f32 0.6931472, %v132_v37 }
 0x1f5   :  { %v81_v39 = vadd.f32 %v80_v38, %v35_v4 }
 0x1f7   :  { %v82_v41 = vsub.f32 %v81_v39, %v48_v15 }
 0x1f9   :  { %v83_v42 = vmul.f32 %v82_v41, %v23_v40 }
 0x1fb   :  { %v92_v43 = vsel %vm91_vm4, %v83_v42, 0.0 }
 0x1fc   :  { %93 = vadd.xlane.f32.xlu0 %v92_v43 }
 0x289   :  { %v94_v44 = vpop.xlane.xlu0 %93 }
 0x28a   :  { %v95_v45 = vrot.slane %v94_v44, 4 }
 0x28c   :  { %v96_v46 = vadd.f32 %v95_v45, %v94_v44 }
 0x28e   :  { %v97_v47 = vrot.slane %v96_v46, 2 }
 0x290   :  { %v98_v48 = vadd.f32 %v97_v47, %v96_v46 }
 0x292   :  { %v99_v49 = vrot.slane %v98_v48, 1 }
 0x294   :  { %v100_v50 = vadd.f32 %v99_v49, %v98_v48 }
 0x296   :  { %119 = vpush %v100_v50 }
 0x2c7   :  { %s120_s26 = spop %119 }
 0x2c8   :  { %v102_v51 = vstv %s120_s26 }
 0x2c9   :  { %103 = vst [vmem:[#allocation2] sm:$0x1] %v102_v51 }
 0x2ca   :  { %144 = shalt.err (!%p141_p4)
}
 0x2cb   :  { %s145_s30 = scalar_lea.hbm %s225_s5, 16 }
 0x2cc   :  { %p146_p5 = scmp.ne.s32.totalorder %s225_s5, %s145_s30  ;;  %p149_p6 = scmp.lt.u32.totalorder %s145_s30, %s225_s5 }
 0x2ce   :  { %p151_p7 = pnand %p149_p6, %p146_p5 }
 0x2d0   :  { %154 = shalt.err (!%p151_p7)
}
 0x2d1   :  { %113 = dma.vmem_to_hbm [thread:$0]  %s111_s25, 16, %s225_s5, [#allocation3]  }
 0x2d2   :  { %155 = dma.done.wait [#allocation3], 16  }
 0x2d3   :  { %156 = vsyncadd [#allocation3], 4294967280 }
 0x2d4   :  { %117 = vsyncpa [#allocation3], 1 }

</bundles_post_ra>
